<compile_context>
chip_gen: v5e
topology: v5e:2x2
jax: 0.10.0
libtpu: 0.0.40
codegen_flags: <defaults>
</compile_context>

<pallas_src>
import math

import jax
import jax.numpy as jnp
from jax.experimental import pallas as pl
from jax.experimental.pallas import tpu as pltpu


def _round_up(a: int, b: int) -> int:
    return (a + b - 1) // b * b


# -----------------------------------------------------------------------------
# Kernel: fused linear(6->2) + bias + sigmoid on lane-dense (feature, N) slabs
# -----------------------------------------------------------------------------
def _linear_sigmoid_kernel(xt_ref, w_ref, b_ref, f_ref, i_ref):
    # xt_ref : (6, TILE_N) f32 VMEM  -- x^T tile, features on sublanes
    # w_ref  : (2, 6)      f32 SMEM  -- nn.Linear.weight (resident scalars)
    # b_ref  : (2,)        f32 SMEM  -- nn.Linear.bias
    # f_ref  : (1, TILE_N) f32 VMEM
    # i_ref  : (1, TILE_N) f32 VMEM
    rows = [xt_ref[k:k + 1, :] for k in range(6)]  # six lane-dense (1, T) slabs
    for j, o_ref in enumerate((f_ref, i_ref)):
        acc = rows[0] * w_ref[j, 0] + b_ref[j]     # VPU FMAs, unrolled over K=6
        for k in range(1, 6):
            acc = acc + rows[k] * w_ref[j, k]
        o_ref[...] = jax.nn.sigmoid(acc)           # EUP


def transformer_meta_optimizer_forward(x, weight, bias, *, tile_n: int = 32768):
    """Forward pass of TransformerMetaOptimizer.

    Args:
      x:      (N, 6) float32 input.
      weight: (2, 6) float32, same layout as nn.Linear.weight.
      bias:   (2,)   float32, same layout as nn.Linear.bias.
      tile_n: lane-elements processed per grid step (rounded to 128).

    Returns:
      (f, i): two arrays of shape (N, 1), matching torch's x.split(1, 1).
    """
    n, in_feat = x.shape
    assert in_feat == 6

    x = x.astype(jnp.float32)
    weight = weight.astype(jnp.float32)
    bias = bias.astype(jnp.float32)

    # Pad N so every tile is full (lane dim multiple of 128).
    n_pad = _round_up(max(n, 1), 128)
    tile = min(_round_up(tile_n, 128), n_pad)
    n_pad = _round_up(n_pad, tile)

    x_t = x.T                                    # (6, N): N on the lane axis
    if n_pad != n:
        x_t = jnp.pad(x_t, ((0, 0), (0, n_pad - n)))

    grid = (n_pad // tile,)

    f_row, i_row = pl.pallas_call(
        _linear_sigmoid_kernel,
        out_shape=(
            jax.ShapeDtypeStruct((1, n_pad), jnp.float32),
            jax.ShapeDtypeStruct((1, n_pad), jnp.float32),
        ),
        grid=grid,
        in_specs=[
            pl.BlockSpec((6, tile), lambda i: (0, i)),   # x^T tile (VMEM, pipelined)
            pl.BlockSpec(memory_space=pltpu.SMEM),       # weight (2, 6), resident
            pl.BlockSpec(memory_space=pltpu.SMEM),       # bias (2,), resident
        ],
        out_specs=(
            pl.BlockSpec((1, tile), lambda i: (0, i)),   # f row, lane-dense
            pl.BlockSpec((1, tile), lambda i: (0, i)),   # i row, lane-dense
        ),
        compiler_params=pltpu.CompilerParams(
            dimension_semantics=("parallel",),           # megacore-shardable
            vmem_limit_bytes=32 * 1024 * 1024,
        ),
        cost_estimate=pl.CostEstimate(
            flops=24 * n_pad,
            transcendentals=2 * n_pad,
            bytes_accessed=32 * n_pad,                   # 24 B in + 8 B out / row
        ),
    )(x_t, weight, bias)

    # torch split(1, 1) -> two (N, 1) tensors; (1, N) -> (N, 1) reshape is free.
    f = f_row[0, :n].reshape(n, 1)
    i = i_row[0, :n].reshape(n, 1)
    return f, i


# -----------------------------------------------------------------------------
# Deterministic parameter init (mirrors nn.Linear defaults + bias[0] = 1)
# -----------------------------------------------------------------------------
def init_params(key):
    in_features, out_features = 6, 2
    bound = 1.0 / math.sqrt(in_features)
    kw, kb = jax.random.split(key)
    weight = jax.random.uniform(
        kw, (out_features, in_features), jnp.float32, minval=-bound, maxval=bound
    )
    bias = jax.random.uniform(
        kb, (out_features,), jnp.float32, minval=-bound, maxval=bound
    )
    bias = bias.at[0].set(1.0)  # self.linear1.bias.data[0] = 1
    return weight, bias


if __name__ == "__main__":
    key = jax.random.PRNGKey(0)
    kp, kx, kx2 = jax.random.split(key, 3)

    weight, bias = init_params(kp)

    # Small example input consistent with forward(): (batch, 6)
    x = jax.random.normal(kx, (8, 6), jnp.float32)
    f, i = transformer_meta_optimizer_forward(x, weight, bias)
    jax.block_until_ready((f, i))

    ref = jax.nn.sigmoid(x @ weight.T + bias)
    assert f.shape == (8, 1) and i.shape == (8, 1)
    assert jnp.allclose(f[:, 0], ref[:, 0], atol=1e-5)
    assert jnp.allclose(i[:, 0], ref[:, 1], atol=1e-5)

    # Exercise the multi-tile / ragged-N path: N=300 with 128-lane tiles -> grid=(3,)
    x2 = jax.random.normal(kx2, (300, 6), jnp.float32)
    f2, i2 = transformer_meta_optimizer_forward(x2, weight, bias, tile_n=128)
    jax.block_until_ready((f2, i2))
    ref2 = jax.nn.sigmoid(x2 @ weight.T + bias)
    assert f2.shape == (300, 1) and i2.shape == (300, 1)
    assert jnp.allclose(f2[:, 0], ref2[:, 0], atol=1e-5)
    assert jnp.allclose(i2[:, 0], ref2[:, 1], atol=1e-5)

    print("KERNEL_OK")
</pallas_src>

<mosaic_0001>
module attributes {stable_mosaic.version = 11 : i64} {
  func.func @_linear_sigmoid_kernel(%arg0: i32, %arg1: memref<6x128xf32, #tpu.memory_space<vmem>>, %arg2: memref<2x6xf32, #tpu.memory_space<smem>>, %arg3: memref<2xf32, #tpu.memory_space<smem>>, %arg4: memref<1x128xf32, #tpu.memory_space<vmem>>, %arg5: memref<1x128xf32, #tpu.memory_space<vmem>>) attributes {dimension_semantics = [#tpu.dimension_semantics<parallel>], iteration_bounds = array<i64: 1>, scalar_prefetch = 0 : i64, scratch_operands = 0 : i64, tpu.core_type = #tpu.core_type<tc>, window_params = [{transform_indices = @transform_0, window_bounds = array<i64: 6, 128>}, {transform_indices = @transform_1, window_bounds = array<i64: 2, 6>}, {transform_indices = @transform_2, window_bounds = array<i64: 2>}, {transform_indices = @transform_3, window_bounds = array<i64: 1, 128>}, {transform_indices = @transform_4, window_bounds = array<i64: 1, 128>}]} {
    %c0 = arith.constant 0 : index
    %c0_0 = arith.constant 0 : index
    %0 = vector.load %arg1[%c0, %c0_0] : memref<6x128xf32, #tpu.memory_space<vmem>>, vector<1x128xf32>
    %c1 = arith.constant 1 : index
    %c0_1 = arith.constant 0 : index
    %1 = vector.load %arg1[%c1, %c0_1] : memref<6x128xf32, #tpu.memory_space<vmem>>, vector<1x128xf32>
    %c2 = arith.constant 2 : index
    %c0_2 = arith.constant 0 : index
    %2 = vector.load %arg1[%c2, %c0_2] : memref<6x128xf32, #tpu.memory_space<vmem>>, vector<1x128xf32>
    %c3 = arith.constant 3 : index
    %c0_3 = arith.constant 0 : index
    %3 = vector.load %arg1[%c3, %c0_3] : memref<6x128xf32, #tpu.memory_space<vmem>>, vector<1x128xf32>
    %c4 = arith.constant 4 : index
    %c0_4 = arith.constant 0 : index
    %4 = vector.load %arg1[%c4, %c0_4] : memref<6x128xf32, #tpu.memory_space<vmem>>, vector<1x128xf32>
    %c5 = arith.constant 5 : index
    %c0_5 = arith.constant 0 : index
    %5 = vector.load %arg1[%c5, %c0_5] : memref<6x128xf32, #tpu.memory_space<vmem>>, vector<1x128xf32>
    %c0_6 = arith.constant 0 : index
    %c0_7 = arith.constant 0 : index
    %6 = memref.load %arg2[%c0_6, %c0_7] : memref<2x6xf32, #tpu.memory_space<smem>>
    %7 = vector.broadcast %6 : f32 to vector<1x128xf32>
    %8 = arith.mulf %0, %7 : vector<1x128xf32>
    %c0_8 = arith.constant 0 : index
    %9 = memref.load %arg3[%c0_8] : memref<2xf32, #tpu.memory_space<smem>>
    %10 = vector.broadcast %9 : f32 to vector<1x128xf32>
    %11 = arith.addf %8, %10 : vector<1x128xf32>
    %c0_9 = arith.constant 0 : index
    %c1_10 = arith.constant 1 : index
    %12 = memref.load %arg2[%c0_9, %c1_10] : memref<2x6xf32, #tpu.memory_space<smem>>
    %13 = vector.broadcast %12 : f32 to vector<1x128xf32>
    %14 = arith.mulf %1, %13 : vector<1x128xf32>
    %15 = arith.addf %11, %14 : vector<1x128xf32>
    %c0_11 = arith.constant 0 : index
    %c2_12 = arith.constant 2 : index
    %16 = memref.load %arg2[%c0_11, %c2_12] : memref<2x6xf32, #tpu.memory_space<smem>>
    %17 = vector.broadcast %16 : f32 to vector<1x128xf32>
    %18 = arith.mulf %2, %17 : vector<1x128xf32>
    %19 = arith.addf %15, %18 : vector<1x128xf32>
    %c0_13 = arith.constant 0 : index
    %c3_14 = arith.constant 3 : index
    %20 = memref.load %arg2[%c0_13, %c3_14] : memref<2x6xf32, #tpu.memory_space<smem>>
    %21 = vector.broadcast %20 : f32 to vector<1x128xf32>
    %22 = arith.mulf %3, %21 : vector<1x128xf32>
    %23 = arith.addf %19, %22 : vector<1x128xf32>
    %c0_15 = arith.constant 0 : index
    %c4_16 = arith.constant 4 : index
    %24 = memref.load %arg2[%c0_15, %c4_16] : memref<2x6xf32, #tpu.memory_space<smem>>
    %25 = vector.broadcast %24 : f32 to vector<1x128xf32>
    %26 = arith.mulf %4, %25 : vector<1x128xf32>
    %27 = arith.addf %23, %26 : vector<1x128xf32>
    %c0_17 = arith.constant 0 : index
    %c5_18 = arith.constant 5 : index
    %28 = memref.load %arg2[%c0_17, %c5_18] : memref<2x6xf32, #tpu.memory_space<smem>>
    %29 = vector.broadcast %28 : f32 to vector<1x128xf32>
    %30 = arith.mulf %5, %29 : vector<1x128xf32>
    %31 = arith.addf %27, %30 : vector<1x128xf32>
    %32 = arith.negf %31 : vector<1x128xf32>
    %33 = math.exp %32 : vector<1x128xf32>
    %cst = arith.constant 1.000000e+00 : f32
    %34 = vector.broadcast %cst : f32 to vector<1x128xf32>
    %35 = arith.addf %34, %33 : vector<1x128xf32>
    %36 = arith.divf %34, %35 : vector<1x128xf32>
    %c0_19 = arith.constant 0 : index
    %c0_20 = arith.constant 0 : index
    %37 = vector.load %arg4[%c0_19, %c0_20] : memref<1x128xf32, #tpu.memory_space<vmem>>, vector<1x128xf32>
    tpu.vector_store %arg4[%c0_19, %c0_20], %36 {strides = array<i32>} : memref<1x128xf32, #tpu.memory_space<vmem>>, vector<1x128xf32>,
    %c1_21 = arith.constant 1 : index
    %c0_22 = arith.constant 0 : index
    %38 = memref.load %arg2[%c1_21, %c0_22] : memref<2x6xf32, #tpu.memory_space<smem>>
    %39 = vector.broadcast %38 : f32 to vector<1x128xf32>
    %40 = arith.mulf %0, %39 : vector<1x128xf32>
    %c1_23 = arith.constant 1 : index
    %41 = memref.load %arg3[%c1_23] : memref<2xf32, #tpu.memory_space<smem>>
    %42 = vector.broadcast %41 : f32 to vector<1x128xf32>
    %43 = arith.addf %40, %42 : vector<1x128xf32>
    %c1_24 = arith.constant 1 : index
    %c1_25 = arith.constant 1 : index
    %44 = memref.load %arg2[%c1_24, %c1_25] : memref<2x6xf32, #tpu.memory_space<smem>>
    %45 = vector.broadcast %44 : f32 to vector<1x128xf32>
    %46 = arith.mulf %1, %45 : vector<1x128xf32>
    %47 = arith.addf %43, %46 : vector<1x128xf32>
    %c1_26 = arith.constant 1 : index
    %c2_27 = arith.constant 2 : index
    %48 = memref.load %arg2[%c1_26, %c2_27] : memref<2x6xf32, #tpu.memory_space<smem>>
    %49 = vector.broadcast %48 : f32 to vector<1x128xf32>
    %50 = arith.mulf %2, %49 : vector<1x128xf32>
    %51 = arith.addf %47, %50 : vector<1x128xf32>
    %c1_28 = arith.constant 1 : index
    %c3_29 = arith.constant 3 : index
    %52 = memref.load %arg2[%c1_28, %c3_29] : memref<2x6xf32, #tpu.memory_space<smem>>
    %53 = vector.broadcast %52 : f32 to vector<1x128xf32>
    %54 = arith.mulf %3, %53 : vector<1x128xf32>
    %55 = arith.addf %51, %54 : vector<1x128xf32>
    %c1_30 = arith.constant 1 : index
    %c4_31 = arith.constant 4 : index
    %56 = memref.load %arg2[%c1_30, %c4_31] : memref<2x6xf32, #tpu.memory_space<smem>>
    %57 = vector.broadcast %56 : f32 to vector<1x128xf32>
    %58 = arith.mulf %4, %57 : vector<1x128xf32>
    %59 = arith.addf %55, %58 : vector<1x128xf32>
    %c1_32 = arith.constant 1 : index
    %c5_33 = arith.constant 5 : index
    %60 = memref.load %arg2[%c1_32, %c5_33] : memref<2x6xf32, #tpu.memory_space<smem>>
    %61 = vector.broadcast %60 : f32 to vector<1x128xf32>
    %62 = arith.mulf %5, %61 : vector<1x128xf32>
    %63 = arith.addf %59, %62 : vector<1x128xf32>
    %64 = arith.negf %63 : vector<1x128xf32>
    %65 = math.exp %64 : vector<1x128xf32>
    %cst_34 = arith.constant 1.000000e+00 : f32
    %66 = vector.broadcast %cst_34 : f32 to vector<1x128xf32>
    %67 = arith.addf %66, %65 : vector<1x128xf32>
    %68 = arith.divf %66, %67 : vector<1x128xf32>
    %c0_35 = arith.constant 0 : index
    %c0_36 = arith.constant 0 : index
    %69 = vector.load %arg5[%c0_35, %c0_36] : memref<1x128xf32, #tpu.memory_space<vmem>>, vector<1x128xf32>
    tpu.vector_store %arg5[%c0_35, %c0_36], %68 {strides = array<i32>} : memref<1x128xf32, #tpu.memory_space<vmem>>, vector<1x128xf32>,
    return
  }
  func.func @transform_0(%arg0: i32) -> (i32, i32) {
    %c0_i32 = arith.constant 0 : i32
    %c0_i32_0 = arith.constant 0 : i32
    return %c0_i32, %arg0 : i32, i32
  }
  func.func @transform_1(%arg0: i32) -> (i32, i32) {
    %c0_i32 = arith.constant 0 : i32
    %c0_i32_0 = arith.constant 0 : i32
    %c0_i32_1 = arith.constant 0 : i32
    return %c0_i32, %c0_i32_0 : i32, i32
  }
  func.func @transform_2(%arg0: i32) -> i32 {
    %c0_i32 = arith.constant 0 : i32
    %c0_i32_0 = arith.constant 0 : i32
    return %c0_i32 : i32
  }
  func.func @transform_3(%arg0: i32) -> (i32, i32) {
    %c0_i32 = arith.constant 0 : i32
    %c0_i32_0 = arith.constant 0 : i32
    return %c0_i32, %arg0 : i32, i32
  }
  func.func @transform_4(%arg0: i32) -> (i32, i32) {
    %c0_i32 = arith.constant 0 : i32
    %c0_i32_0 = arith.constant 0 : i32
    return %c0_i32, %arg0 : i32, i32
  }
}

</mosaic_0001>

<bundles_post_ra>
// kernel: tpu_custom_call.1
= control target key start
LH: loop header
LB: loop body
LE: loop exit
PB: predicated region body
PF: predicated region fallthrough
CT: control target
= control target key end

     0   :  { %10 = vsyncpa [#allocation3], 0  ;;  %s368_s0 = inlined_call_operand.hbm [shape: f32[6,128], index: 0, kind: input, shape index: {}]   ;;  %s369_s1 = inlined_call_operand.hbm [shape: f32[2,6], index: 1, kind: input, shape index: {}]   ;;  %s370_s2 = inlined_call_operand.vmem [shape: f32[2], index: 2, kind: input, shape index: {}]   ;;  %s371_s3 = inlined_call_operand.hbm [shape: f32[1,128], index: 3, kind: output, shape index: {0}]   ;;  %s372_s4 = inlined_call_operand.hbm [shape: f32[1,128], index: 4, kind: output, shape index: {1}]  }
   0x1   :  { %11 = vsyncpa [#allocation5], 0 }
   0x2   :  { %12 = vsyncpa [#allocation6], 0 }
   0x3   :  { %13 = vsyncpa [#allocation4], 0 }
   0x4   :  { %14 = vsyncpa [#allocation11], 0  ;;  %s20_s17 = sshll.u32 %s368_s0, 4  ;;  %s323_s18 = smov [#allocation2]   ;;  %s21_s17 = int_to_ptr.hbm [resolvable:$true] %s20_s17 }
   0x5   :  { %s22_s19 = sshll.u32 %s323_s18, 4  ;;  %s31_s22 = sshll.u32 %s369_s1, 4  ;;  %s23_s19 = int_to_ptr.vmem [resolvable:$true] %s22_s19  ;;  %s32_s22 = int_to_ptr.hbm [resolvable:$true] %s31_s22 }
   0x6   :  { %25 = dma.hbm_to_vmem [thread:$0]  %s21_s17, 128, %s23_s19, [#allocation3]  }
   0x7   :  { %s324_s23 = smov [#allocation7]   ;;  %s40_s26 = sshll.u32 %s370_s2, 4  ;;  %s41_s26 = int_to_ptr.vmem [resolvable:$true] %s40_s26 }
   0x8   :  { %34 = dma.hbm_to_smem %s32_s22, 32, %s324_s23, [#allocation5]  }
   0x9   :  { %s325_s27 = smov [#allocation8]  }
   0xa   :  { %43 = dma.vmem_to_smem %s41_s26, 16, %s325_s27, [#allocation6]  }
   0xb   :  { %313 = dma.done.wait [#allocation3], 128  }
   0xc   :  { %314 = vsyncadd [#allocation3], 4294967168 }
   0xd   :  { %315 = dma.done.wait [#allocation5], 32  }
   0xe   :  { %316 = vsyncadd [#allocation5], 4294967264 }
   0xf   :  { %317 = dma.done.wait [#allocation6], 16  }
  0x10   :  { %318 = vsyncadd [#allocation6], 4294967280 }
  0x11   :  { %56 = sfence }
  0x12   :  { %s63_s0 = sld [smem:[#allocation7]]  ;;  %v57_v0 = vld [vmem:[#allocation2] sm:$0x1]  ;;  %v58_v1 = vld [vmem:[#allocation2 + $0x1] sm:$0x1]  ;;  %s326_s13 = smov [#allocation9]  }
  0x13   :  { %s66_s1 = sld [smem:[#allocation8]]  ;;  %v59_v3 = vld [vmem:[#allocation2 + $0x2] sm:$0x1]  ;;  %v60_v6 = vld [vmem:[#allocation2 + $0x3] sm:$0x1]  ;;  %s160_s14 = sshll.u32 %s326_s13, 4  ;;  %s161_s14 = int_to_ptr.vmem [resolvable:$true] %s160_s14 }
  0x14   :  { %s190_s28 = sld [smem:[#allocation7 + $0x1]]  ;;  %v61_v11 = vld [vmem:[#allocation2 + $0x4] sm:$0x1]  ;;  %v62_v17 = vld [vmem:[#allocation2 + $0x5] sm:$0x1]  ;;  %s162_s17 = sshll.u32 %s371_s3, 4  ;;  %s163_s17 = int_to_ptr.hbm [resolvable:$true] %s162_s17 }
  0x15   :  { %s191_s29 = sld [smem:[#allocation7 + $0x2]]  ;;  %s327_s18 = smov [#allocation10]  }
  0x16   :  { %s192_s30 = sld [smem:[#allocation7 + $0x3]]  ;;  %s171_s3 = sshll.u32 %s327_s18, 4  ;;  %s172_s3 = int_to_ptr.vmem [resolvable:$true] %s171_s3 }
  0x17   :  { %s193_s5 = sld [smem:[#allocation7 + $0x4]]  ;;  %s173_s21 = sshll.u32 %s372_s4, 4  ;;  %s174_s21 = int_to_ptr.hbm [resolvable:$true] %s173_s21 }
  0x18   :  { %v64_v2 = vstv %s63_s0  ;;  %s194_s2 = sld [smem:[#allocation7 + $0x5]] }
  0x19   :  { %v65_v4 = vmul.f32 %v64_v2, %v57_v0  ;;  %v67_v5 = vstv %s66_s1  ;;  %s196_s6 = sld [smem:[#allocation7 + $0x80]] }
  0x1a   :  { %v70_v7 = vstv %s190_s28  ;;  %s197_s7 = sld [smem:[#allocation8 + $0x1]] }
  0x1b   :  { %v68_v8 = vadd.f32 %v67_v5, %v65_v4  ;;  %v71_v9 = vmul.f32 %v70_v7, %v58_v1  ;;  %v74_v10 = vstv %s191_s29  ;;  %s198_s8 = sld [smem:[#allocation7 + $0x81]] }
  0x1c   :  { %v75_v12 = vmul.f32 %v74_v10, %v59_v3  ;;  %v78_v13 = vstv %s192_s30  ;;  %s199_s9 = sld [smem:[#allocation7 + $0x82]] }
  0x1d   :  { %v72_v14 = vadd.f32 %v71_v9, %v68_v8  ;;  %v79_v15 = vmul.f32 %v78_v13, %v60_v6  ;;  %v82_v16 = vstv %s193_s5  ;;  %s200_s10 = sld [smem:[#allocation7 + $0x83]] }
  0x1e   :  { %v86_v18 = vstv %s194_s2  ;;  %s201_s11 = sld [smem:[#allocation7 + $0x84]]  ;;  %v83_v20 = vmul.f32 %v82_v16, %v61_v11 }
  0x1f   :  { %v76_v19 = vadd.f32 %v75_v12, %v72_v14  ;;  %v110_v21 = vstv %s196_s6  ;;  %s202_s12 = sld [smem:[#allocation7 + $0x85]]  ;;  %v87_v25 = vmul.f32 %v86_v18, %v62_v17 }
  0x20   :  { %v111_v22 = vmul.f32 %v110_v21, %v57_v0  ;;  %v113_v23 = vstv %s197_s7 }
  0x21   :  { %v80_v24 = vadd.f32 %v79_v15, %v76_v19  ;;  %v116_v26 = vstv %s198_s8 }
  0x22   :  { %v114_v27 = vadd.f32 %v113_v23, %v111_v22  ;;  %v117_v28 = vmul.f32 %v116_v26, %v58_v1  ;;  %v120_v29 = vstv %s199_s9 }
  0x23   :  { %v84_v30 = vadd.f32 %v83_v20, %v80_v24  ;;  %v121_v31 = vmul.f32 %v120_v29, %v59_v3  ;;  %v124_v32 = vstv %s200_s10 }
  0x24   :  { %v118_v33 = vadd.f32 %v117_v28, %v114_v27  ;;  %v125_v34 = vmul.f32 %v124_v32, %v60_v6  ;;  %v128_v35 = vstv %s201_s11 }
  0x25   :  { %v88_v36 = vadd.f32 %v87_v25, %v84_v30  ;;  %v132_v37 = vstv %s202_s12  ;;  %v129_v39 = vmul.f32 %v128_v35, %v61_v11 }
  0x26   :  { %v122_v38 = vadd.f32 %v121_v31, %v118_v33  ;;  %v133_v42 = vmul.f32 %v132_v37, %v62_v17 }
  0x27   :  { %v195_v40 = vmul.f32 -1.442695, %v88_v36 }
  0x28   :  { %v126_v41 = vadd.f32 %v125_v34, %v122_v38 }
  0x29   :  { %209 = vpow2.f32 %v195_v40 }
  0x2a   :  { %v130_v43 = vadd.f32 %v129_v39, %v126_v41 }
  0x2c   :  { %v134_v44 = vadd.f32 %v133_v42, %v130_v43 }
  0x2e   :  { %v203_v45 = vmul.f32 -1.442695, %v134_v44 }
  0x2f   :  { %v210_v46 = vpop.eup %209 }
  0x30   :  { %v92_v47 = vadd.f32 1.0, %v210_v46  ;;  %211 = vpow2.f32 %v203_v45 }
  0x32   :  { %213 = vrcp.f32 %v92_v47  ;;  %v104_v52 = vand.u32 2147483648, %v92_v47  ;;  %vm98_vm0 = vweird.f32 %v92_v47  ;;  %v102_v54 = vand.u32 2147483647, %v92_v47 }
  0x34   :  { %v105_v56 = vor.u32 1.1754944e-38, %v104_v52  ;;  %vm103_vm3 = vcmp.eq.f32.partialorder %v102_v54, 8.507059e+37 }
  0x36   :  { %v212_v48 = vpop.eup %211 }
  0x37   :  { %v138_v49 = vadd.f32 1.0, %v212_v48 }
  0x38   :  { %v214_v50 = vpop.eup %213 }
  0x39   :  { %v94_v51 = vmul.f32 %v214_v50, %v92_v47  ;;  %215 = vrcp.f32 %v138_v49  ;;  %vm99_vm1 = vweird.f32 %v214_v50  ;;  %vm144_vm4 = vweird.f32 %v138_v49 }
  0x3a   :  { %vm100_vm2 = vmor %vm98_vm0, %vm99_vm1  ;;  %v150_v61 = vand.u32 2147483648, %v138_v49  ;;  %v148_v0 = vand.u32 2147483647, %v138_v49 }
  0x3b   :  { %v95_v53 = vsub.f32 1.0, %v94_v51 }
  0x3c   :  { %v151_v2 = vor.u32 1.1754944e-38, %v150_v61  ;;  %vm149_vm7 = vcmp.eq.f32.partialorder %v148_v0, 8.507059e+37 }
  0x3d   :  { %v96_v55 = vmul.f32 %v214_v50, %v95_v53 }
  0x3f   :  { %v216_v57 = vpop.eup %215  ;;  %v97_v58 = vadd.f32 %v214_v50, %v96_v55 }
  0x40   :  { %v140_v59 = vmul.f32 %v216_v57, %v138_v49  ;;  %vm145_vm5 = vweird.f32 %v216_v57 }
  0x41   :  { %v101_v60 = vsel %vm100_vm2, %v214_v50, %v97_v58  ;;  %vm146_vm6 = vmor %vm144_vm4, %vm145_vm5 }
  0x42   :  { %v106_v62 = vsel %vm103_vm3, %v105_v56, %v101_v60  ;;  %v141_v63 = vsub.f32 1.0, %v140_v59 }
  0x43   :  { %108 = vst [vmem:[#allocation9] sm:$0x1] %v106_v62 }
  0x44   :  { %v142_v1 = vmul.f32 %v216_v57, %v141_v63  ;;  %165 = dma.vmem_to_hbm [thread:$0]  %s161_s14, 16, %s163_s17, [#allocation4]  }
  0x46   :  { %v143_v3 = vadd.f32 %v216_v57, %v142_v1 }
  0x48   :  { %v147_v4 = vsel %vm146_vm6, %v216_v57, %v143_v3 }
  0x49   :  { %v152_v5 = vsel %vm149_vm7, %v151_v2, %v147_v4 }
  0x4a   :  { %154 = vst [vmem:[#allocation10] sm:$0x1] %v152_v5 }
  0x4b   :  { %176 = dma.vmem_to_hbm [thread:$0]  %s172_s3, 16, %s174_s21, [#allocation11]  }
  0x4c   :  { %319 = dma.done.wait [#allocation4], 16  }
  0x4d   :  { %320 = vsyncadd [#allocation4], 4294967280 }
  0x4e   :  { %321 = dma.done.wait [#allocation11], 16  }
  0x4f   :  { %322 = vsyncadd [#allocation11], 4294967280 }
  0x50   :  { %185 = vsyncpa [#allocation3], 1 }
  0x51   :  { %186 = vsyncpa [#allocation4], 1 }
  0x52   :  { %187 = vsyncpa [#allocation11], 1 }
  0x53   :  { %188 = vsyncpa [#allocation5], 1 }
  0x54   :  { %189 = vsyncpa [#allocation6], 1 }

</bundles_post_ra>
